<compile_context>
chip_gen: v7x
topology: tpu7x:2x2x1
jax: 0.10.0
libtpu: 0.0.40
codegen_flags: <defaults>
</compile_context>

<pallas_src>
import functools

import jax
import jax.numpy as jnp
from jax import lax
from jax.experimental import pallas as pl
from jax.experimental.pallas import tpu as pltpu


def bahdanau_fused_kernel(ctxt_ref, mask_ref, w1_ref, b1_ref, w2_ref, b2_ref,
                          out_ref, alpha_ref, *, approx_recip=True):
    """One grid step == all L labels for one batch tile.

    ctxt_ref  : (TB, T, C)   context tile (matmul dtype)
    mask_ref  : (TB, 1, T)   float mask tile (lane-dense in T)
    w1_ref    : (C, LHp)     all-label ctxt_proj weights (lanes padded to 128k)
    b1_ref    : (1, LHp)     all-label ctxt_proj biases (f32)
    w2_ref    : (LHp, L)     block-diagonal scores_proj weights
    b2_ref    : (1, L)       scores_proj biases (f32)
    out_ref   : (TB, L, C)   attention-weighted context (f32)
    alpha_ref : (TB, L, T)   attention weights, PyTorch layout (f32)
    """
    ctxt = ctxt_ref[...]
    mask = mask_ref[...]

    TB, T, C = ctxt.shape
    L = w2_ref.shape[1]

    # (1) Projection of ALL labels with a single MXU matmul, f32 accumulation.
    x = ctxt.reshape(TB * T, C)
    proj = jnp.tanh(
        jnp.dot(x, w1_ref[...], preferred_element_type=jnp.float32)
        + b1_ref[...])                                        # (TB*T, LHp) f32

    # (2) Scores of ALL labels with one MXU matmul against block-diag W2.
    scores = (jnp.dot(proj.astype(w2_ref.dtype), w2_ref[...],
                      preferred_element_type=jnp.float32)
              + b2_ref[...])                                  # (TB*T, L) f32
    # Small in-kernel relayout to the PyTorch / lane-dense layout: T on lanes.
    scores = jnp.swapaxes(scores.reshape(TB, T, L), 1, 2)     # (TB, L, T)

    # (3) Mask with a single select + numerically stable softmax over T (lanes).
    scores = jnp.where(mask > 0.0, scores, jnp.float32(-1000000.0))
    m = jnp.max(scores, axis=-1, keepdims=True)               # (TB, L, 1)
    e = jnp.exp(scores - m)
    denom = jnp.sum(e, axis=-1, keepdims=True)                # (TB, L, 1)
    # Reciprocal on the EUP slot keeps the VALU slot free.
    alpha = e * pl.reciprocal(denom, approx=approx_recip)     # (TB, L, T) f32

    # (4) Attention readout on the MXU:
    #     out[b, l, c] = sum_t alpha[b, l, t] * ctxt[b, t, c]
    out = lax.dot_general(alpha.astype(ctxt.dtype), ctxt,
                          (((2,), (1,)), ((0,), (0,))),
                          preferred_element_type=jnp.float32)  # (TB, L, C)

    out_ref[...] = out.astype(out_ref.dtype)
    alpha_ref[...] = alpha.astype(alpha_ref.dtype)


def _round_up(x, m):
    return ((x + m - 1) // m) * m


def _tpu_vmem_capacity_bytes():
    """Physical VMEM per TensorCore; falls back to the v7x floor (64 MiB)."""
    try:
        return int(pltpu.get_tpu_info().vmem_capacity_bytes)
    except Exception:
        return 64 * 1024 * 1024


def _pick_batch_tile(B, T, C, L, LHp, itemsize, budget_bytes, min_grid_steps):
    """Largest divisor-of-B batch tile whose REAL VMEM working set fits.

    Counts the double-buffered BlockSpec I/O tiles *and* the in-kernel f32
    intermediates (proj dominates: T*LHp f32 per batch row), plus the
    double-buffered weights.  Also enforces >= min_grid_steps grid steps so
    (a) both v7x TensorCores get work under "parallel" semantics and
    (b) the next tile's context DMA hides behind the current tile's compute.
    """
    f32 = 4
    io_per_b = 2 * (itemsize * T * C        # context in (double-buffered)
                    + f32 * 1 * T           # mask in
                    + f32 * L * C           # outputs
                    + f32 * L * T)          # alphas
    interm_per_b = (f32 * T * LHp           # proj (f32)
                    + itemsize * T * LHp    # proj cast for the 2nd matmul
                    + 4 * f32 * L * T       # scores / e / alpha / transpose tmp
                    + f32 * L * C           # readout accumulator
                    + itemsize * L * T)     # alpha cast for the readout
    per_b = io_per_b + interm_per_b
    weight_bytes = 2 * (itemsize * (C * LHp + LHp * L) + f32 * (LHp + L))

    tb = B if B < min_grid_steps else max(B // min_grid_steps, 1)
    while tb > 1 and (tb * per_b + weight_bytes) > budget_bytes:
        tb -= 1
    while tb > 1 and B % tb != 0:
        tb -= 1
    return max(tb, 1)


def bahdanau_attention(context, mask, w1, b1, w2, b2, *,
                       matmul_dtype=jnp.bfloat16,
                       approx_recip=True,
                       vmem_budget_bytes=None,
                       min_grid_steps=2):
    """context: (B, T, C) f32; mask: (B, T) int/float (0/1).

    w1: (L, C, H), b1: (L, 1, H), w2: (L, 1, H), b2: (L, 1, 1)
    matmul_dtype: MXU operand dtype (bf16 default; accumulation is always f32).
    Returns (outputs (B, L, C) f32, alphas (B, L, T) f32) — PyTorch layouts.
    """
    B, T, C = context.shape
    L, _, H = w1.shape
    LH = L * H
    LHp = _round_up(LH, 128)                 # lane-align the projection width
    itemsize = jnp.dtype(matmul_dtype).itemsize

    # ---- Fuse + pad per-label parameters once (pure layout work) ----
    # (L, C, H) -> (C, L*H) -> (C, LHp): one matmul projects all labels at once.
    w1_all = jnp.transpose(w1, (1, 0, 2)).reshape(C, LH)
    w1_all = jnp.pad(w1_all, ((0, 0), (0, LHp - LH))).astype(matmul_dtype)
    b1_all = jnp.pad(b1.reshape(1, LH),
                     ((0, 0), (0, LHp - LH))).astype(jnp.float32)
    # (L, H) -> block-diagonal (LHp, L): one matmul scores all labels at once.
    w2_flat = w2.reshape(L, H)
    w2_bd = (w2_flat[:, :, None]
             * jnp.eye(L, dtype=w2.dtype)[:, None, :]).reshape(LH, L)
    w2_bd = jnp.pad(w2_bd, ((0, LHp - LH), (0, 0))).astype(matmul_dtype)
    b2_all = b2.reshape(1, L).astype(jnp.float32)

    ctxt = context.astype(matmul_dtype)
    mask_f = mask.astype(jnp.float32).reshape(B, 1, T)   # lane-dense mask

    # ---- Per-chip VMEM budget, scoped-VMEM limit, and batch tiling ----
    vmem_cap = _tpu_vmem_capacity_bytes()
    if vmem_budget_bytes is None:
        # ~55% of physical VMEM, capped; leaves headroom for compiler scratch.
        # v5e/v6e (128 MiB) -> ~70 MiB; v7x (64 MiB) -> ~35 MiB.
        vmem_budget_bytes = min(int(vmem_cap * 0.55), 80 * 1024 * 1024)
    vmem_limit_bytes = int(min(vmem_budget_bytes + (16 << 20),
                               int(vmem_cap * 0.9)))

    tb = _pick_batch_tile(B, T, C, L, LHp, itemsize,
                          vmem_budget_bytes, min_grid_steps)
    grid = (B // tb,)

    # ---- Advisory cost estimate for the XLA scheduler ----
    flops = 2 * B * T * C * LHp + 2 * B * T * LHp * L + 2 * B * L * T * C
    transcendentals = B * T * LHp + B * L * T
    bytes_accessed = (itemsize * (B * T * C + C * LHp + LHp * L)
                      + 4 * (B * T + LHp + L + B * L * C + B * L * T))

    kernel = functools.partial(bahdanau_fused_kernel, approx_recip=approx_recip)

    outputs, alphas = pl.pallas_call(
        kernel,
        out_shape=(
            jax.ShapeDtypeStruct((B, L, C), jnp.float32),
            jax.ShapeDtypeStruct((B, L, T), jnp.float32),
        ),
        grid_spec=pltpu.PrefetchScalarGridSpec(
            num_scalar_prefetch=0,
            grid=grid,
            in_specs=[
                pl.BlockSpec((tb, T, C), lambda i: (i, 0, 0)),   # context tile
                pl.BlockSpec((tb, 1, T), lambda i: (i, 0, 0)),   # mask tile
                # Weights/biases are grid-invariant (constant index maps).
                # pipeline_mode=pl.Buffered(1) would reclaim their 2nd buffer;
                # left at the default for broad compiler compatibility.
                pl.BlockSpec((C, LHp), lambda i: (0, 0)),        # fused W1
                pl.BlockSpec((1, LHp), lambda i: (0, 0)),        # fused b1
                pl.BlockSpec((LHp, L), lambda i: (0, 0)),        # block-diag W2
                pl.BlockSpec((1, L), lambda i: (0, 0)),          # fused b2
            ],
            out_specs=[
                pl.BlockSpec((tb, L, C), lambda i: (i, 0, 0)),
                pl.BlockSpec((tb, L, T), lambda i: (i, 0, 0)),
            ],
        ),
        compiler_params=pltpu.CompilerParams(
            dimension_semantics=("parallel",),     # batch tiles are independent
            vmem_limit_bytes=vmem_limit_bytes),
        cost_estimate=pl.CostEstimate(
            flops=int(flops),
            transcendentals=int(transcendentals),
            bytes_accessed=int(bytes_accessed)),
    )(ctxt, mask_f, w1_all, b1_all, w2_bd, b2_all)

    return outputs, alphas


def bahdanau_reference(context, mask, w1, b1, w2, b2):
    """Pure-JAX reference mirroring the PyTorch forward."""
    hp = lax.Precision.HIGHEST
    mask_f = mask.astype(jnp.float32)
    outs, alphas = [], []
    for ix in range(w1.shape[0]):
        proj = jnp.tanh(
            jnp.einsum('btc,ch->bth', context, w1[ix], precision=hp) + b1[ix, 0])
        scores = jnp.einsum('bth,h->bt', proj, w2[ix, 0], precision=hp) + b2[ix, 0, 0]
        scores = scores * mask_f + (1.0 - mask_f) * (-1000000.0)
        alpha = jax.nn.softmax(scores, axis=-1)
        out = jnp.einsum('bt,btc->bc', alpha, context, precision=hp)
        outs.append(out)
        alphas.append(alpha)
    return jnp.stack(outs, axis=1), jnp.stack(alphas, axis=1)


if __name__ == "__main__":
    # Small shapes implied by the module: batch=2, T=8, ctxt_emb=32,
    # key_emb (hidden)=16, num_labels=3.
    B, T, C, H, L = 2, 8, 32, 16, 3

    key = jax.random.PRNGKey(0)
    k_ctxt, k_w1, k_b1, k_w2, k_b2 = jax.random.split(key, 5)

    context = jax.random.normal(k_ctxt, (B, T, C), dtype=jnp.float32)

    # Deterministic parameter init (nn.Linear-style uniform bounds).
    bound1 = 1.0 / jnp.sqrt(jnp.float32(C))
    w1 = jax.random.uniform(k_w1, (L, C, H), jnp.float32, -bound1, bound1)
    b1 = jax.random.uniform(k_b1, (L, 1, H), jnp.float32, -bound1, bound1)
    bound2 = 1.0 / jnp.sqrt(jnp.float32(H))
    w2 = jax.random.uniform(k_w2, (L, 1, H), jnp.float32, -bound2, bound2)
    b2 = jax.random.uniform(k_b2, (L, 1, 1), jnp.float32, -bound2, bound2)

    # Mask like a padded batch: first row fully valid, second row has padding.
    mask = jnp.ones((B, T), dtype=jnp.int32)
    mask = mask.at[1, T - 3:].set(0)

    ref_out, ref_alpha = bahdanau_reference(context, mask, w1, b1, w2, b2)

    # Strict numeric check: f32 MXU operands + exact reciprocal.
    out_f32, alpha_f32 = bahdanau_attention(
        context, mask, w1, b1, w2, b2,
        matmul_dtype=jnp.float32, approx_recip=False)
    out_f32 = jax.block_until_ready(out_f32)
    alpha_f32 = jax.block_until_ready(alpha_f32)
    assert out_f32.shape == (B, L, C) and alpha_f32.shape == (B, L, T)
    assert jnp.allclose(out_f32, ref_out, atol=1e-5, rtol=1e-5)
    assert jnp.allclose(alpha_f32, ref_alpha, atol=1e-5, rtol=1e-5)

    # Default fast path: bf16 MXU operands + approx reciprocal (looser check,
    # bf16 operands round the matmul inputs).
    out_bf, alpha_bf = bahdanau_attention(context, mask, w1, b1, w2, b2)
    out_bf = jax.block_until_ready(out_bf)
    alpha_bf = jax.block_until_ready(alpha_bf)
    assert out_bf.shape == (B, L, C) and alpha_bf.shape == (B, L, T)
    assert jnp.allclose(out_bf, ref_out, atol=1e-1, rtol=1e-1)
    assert jnp.allclose(alpha_bf, ref_alpha, atol=5e-2, rtol=1e-1)

    print("KERNEL_OK")
</pallas_src>

<mosaic_0001>
module attributes {stable_mosaic.version = 11 : i64} {
  func.func @bahdanau_fused_kernel(%arg0: i32, %arg1: memref<1x8x32xf32, #tpu.memory_space<vmem>>, %arg2: memref<1x1x8xf32, #tpu.memory_space<vmem>>, %arg3: memref<32x128xf32, #tpu.memory_space<vmem>>, %arg4: memref<1x128xf32, #tpu.memory_space<vmem>>, %arg5: memref<128x3xf32, #tpu.memory_space<vmem>>, %arg6: memref<1x3xf32, #tpu.memory_space<vmem>>, %arg7: memref<1x3x32xf32, #tpu.memory_space<vmem>>, %arg8: memref<1x3x8xf32, #tpu.memory_space<vmem>>) attributes {dimension_semantics = [#tpu.dimension_semantics<parallel>], iteration_bounds = array<i64: 2>, scalar_prefetch = 0 : i64, scratch_operands = 0 : i64, tpu.core_type = #tpu.core_type<tc>, window_params = [{transform_indices = @transform_0, window_bounds = array<i64: 1, 8, 32>}, {transform_indices = @transform_1, window_bounds = array<i64: 1, 1, 8>}, {pipeline_mode = #tpu.pipeline_mode<synchronous>, transform_indices = @transform_2, window_bounds = array<i64: 32, 128>}, {pipeline_mode = #tpu.pipeline_mode<synchronous>, transform_indices = @transform_3, window_bounds = array<i64: 1, 128>}, {pipeline_mode = #tpu.pipeline_mode<synchronous>, transform_indices = @transform_4, window_bounds = array<i64: 128, 3>}, {pipeline_mode = #tpu.pipeline_mode<synchronous>, transform_indices = @transform_5, window_bounds = array<i64: 1, 3>}, {transform_indices = @transform_6, window_bounds = array<i64: 1, 3, 32>}, {transform_indices = @transform_7, window_bounds = array<i64: 1, 3, 8>}]} {
    %c0 = arith.constant 0 : index
    %c0_0 = arith.constant 0 : index
    %c0_1 = arith.constant 0 : index
    %0 = vector.load %arg1[%c0, %c0_0, %c0_1] : memref<1x8x32xf32, #tpu.memory_space<vmem>>, vector<1x8x32xf32>
    %c0_2 = arith.constant 0 : index
    %c0_3 = arith.constant 0 : index
    %c0_4 = arith.constant 0 : index
    %1 = vector.load %arg2[%c0_2, %c0_3, %c0_4] : memref<1x1x8xf32, #tpu.memory_space<vmem>>, vector<1x1x8xf32>
    %2 = vector.shape_cast %0 : vector<1x8x32xf32> to vector<8x32xf32>
    %c0_5 = arith.constant 0 : index
    %c0_6 = arith.constant 0 : index
    %3 = vector.load %arg3[%c0_5, %c0_6] : memref<32x128xf32, #tpu.memory_space<vmem>>, vector<32x128xf32>
    %cst = arith.constant dense<0.000000e+00> : vector<8x128xf32>
    %4 = tpu.matmul %2, %3, %cst {dimension_numbers = #tpu.dot_dimension_numbers<[1], [0], [0], [1], [0, 0, 1, 1], [], []>} : vector<8x32xf32>, vector<32x128xf32>, vector<8x128xf32> -> vector<8x128xf32>
    %c0_7 = arith.constant 0 : index
    %c0_8 = arith.constant 0 : index
    %5 = vector.load %arg4[%c0_7, %c0_8] : memref<1x128xf32, #tpu.memory_space<vmem>>, vector<1x128xf32>
    %6 = vector.broadcast %5 : vector<1x128xf32> to vector<8x128xf32>
    %7 = arith.addf %4, %6 : vector<8x128xf32>
    %8 = math.tanh %7 : vector<8x128xf32>
    %c0_9 = arith.constant 0 : index
    %c0_10 = arith.constant 0 : index
    %9 = vector.load %arg5[%c0_9, %c0_10] : memref<128x3xf32, #tpu.memory_space<vmem>>, vector<128x3xf32>
    %cst_11 = arith.constant dense<0.000000e+00> : vector<8x3xf32>
    %10 = tpu.matmul %8, %9, %cst_11 {dimension_numbers = #tpu.dot_dimension_numbers<[1], [0], [0], [1], [0, 0, 1, 1], [], []>} : vector<8x128xf32>, vector<128x3xf32>, vector<8x3xf32> -> vector<8x3xf32>
    %c0_12 = arith.constant 0 : index
    %c0_13 = arith.constant 0 : index
    %11 = vector.load %arg6[%c0_12, %c0_13] : memref<1x3xf32, #tpu.memory_space<vmem>>, vector<1x3xf32>
    %12 = vector.broadcast %11 : vector<1x3xf32> to vector<8x3xf32>
    %13 = arith.addf %10, %12 : vector<8x3xf32>
    %14 = vector.shape_cast %13 : vector<8x3xf32> to vector<1x8x3xf32>
    %15 = tpu.transpose %14, [0, 2, 1] : vector<1x8x3xf32> -> vector<1x3x8xf32>
    %cst_14 = arith.constant 0.000000e+00 : f32
    %16 = vector.broadcast %cst_14 : f32 to vector<1x1x8xf32>
    %17 = arith.cmpf ogt, %1, %16 : vector<1x1x8xf32>
    %cst_15 = arith.constant -1.000000e+06 : f32
    %18 = vector.shape_cast %17 : vector<1x1x8xi1> to vector<1x1x8xi1>
    %19 = vector.broadcast %18 : vector<1x1x8xi1> to vector<1x3x8xi1>
    %20 = vector.broadcast %cst_15 : f32 to vector<1x3x8xf32>
    %21 = arith.select %19, %15, %20 : vector<1x3x8xi1>, vector<1x3x8xf32>
    %cst_16 = arith.constant dense<0xFF800000> : vector<1x3xf32>
    %22 = vector.multi_reduction <maximumf>, %21, %cst_16 [2] : vector<1x3x8xf32> to vector<1x3xf32>
    %23 = vector.shape_cast %22 : vector<1x3xf32> to vector<1x3x1xf32>
    %24 = vector.broadcast %23 : vector<1x3x1xf32> to vector<1x3x8xf32>
    %25 = arith.subf %21, %24 : vector<1x3x8xf32>
    %26 = math.exp %25 : vector<1x3x8xf32>
    %cst_17 = arith.constant dense<0.000000e+00> : vector<1x3xf32>
    %27 = vector.multi_reduction <add>, %26, %cst_17 [2] : vector<1x3x8xf32> to vector<1x3xf32>
    %28 = vector.shape_cast %27 : vector<1x3xf32> to vector<1x3x1xf32>
    %29 = tpu.reciprocal %28 : vector<1x3x1xf32> -> vector<1x3x1xf32>
    %30 = vector.broadcast %29 : vector<1x3x1xf32> to vector<1x3x8xf32>
    %31 = arith.mulf %26, %30 : vector<1x3x8xf32>
    %cst_18 = arith.constant dense<0.000000e+00> : vector<1x3x32xf32>
    %32 = tpu.matmul %31, %0, %cst_18 {dimension_numbers = #tpu.dot_dimension_numbers<[2], [1], [1], [2], [0, 0, 0, 1, 1, 2], [0], [0]>} : vector<1x3x8xf32>, vector<1x8x32xf32>, vector<1x3x32xf32> -> vector<1x3x32xf32>
    %c0_19 = arith.constant 0 : index
    %c0_20 = arith.constant 0 : index
    %c0_21 = arith.constant 0 : index
    %33 = vector.load %arg7[%c0_19, %c0_20, %c0_21] : memref<1x3x32xf32, #tpu.memory_space<vmem>>, vector<1x3x32xf32>
    tpu.vector_store %arg7[%c0_19, %c0_20, %c0_21], %32 {strides = array<i32>} : memref<1x3x32xf32, #tpu.memory_space<vmem>>, vector<1x3x32xf32>,
    %c0_22 = arith.constant 0 : index
    %c0_23 = arith.constant 0 : index
    %c0_24 = arith.constant 0 : index
    %34 = vector.load %arg8[%c0_22, %c0_23, %c0_24] : memref<1x3x8xf32, #tpu.memory_space<vmem>>, vector<1x3x8xf32>
    tpu.vector_store %arg8[%c0_22, %c0_23, %c0_24], %31 {strides = array<i32>} : memref<1x3x8xf32, #tpu.memory_space<vmem>>, vector<1x3x8xf32>,
    return
  }
  func.func @transform_0(%arg0: i32) -> (i32, i32, i32) {
    %c0_i32 = arith.constant 0 : i32
    %c0_i32_0 = arith.constant 0 : i32
    %c0_i32_1 = arith.constant 0 : i32
    return %arg0, %c0_i32, %c0_i32_0 : i32, i32, i32
  }
  func.func @transform_1(%arg0: i32) -> (i32, i32, i32) {
    %c0_i32 = arith.constant 0 : i32
    %c0_i32_0 = arith.constant 0 : i32
    %c0_i32_1 = arith.constant 0 : i32
    return %arg0, %c0_i32, %c0_i32_0 : i32, i32, i32
  }
  func.func @transform_2(%arg0: i32) -> (i32, i32) {
    %c0_i32 = arith.constant 0 : i32
    %c0_i32_0 = arith.constant 0 : i32
    %c0_i32_1 = arith.constant 0 : i32
    return %c0_i32, %c0_i32_0 : i32, i32
  }
  func.func @transform_3(%arg0: i32) -> (i32, i32) {
    %c0_i32 = arith.constant 0 : i32
    %c0_i32_0 = arith.constant 0 : i32
    %c0_i32_1 = arith.constant 0 : i32
    return %c0_i32, %c0_i32_0 : i32, i32
  }
  func.func @transform_4(%arg0: i32) -> (i32, i32) {
    %c0_i32 = arith.constant 0 : i32
    %c0_i32_0 = arith.constant 0 : i32
    %c0_i32_1 = arith.constant 0 : i32
    return %c0_i32, %c0_i32_0 : i32, i32
  }
  func.func @transform_5(%arg0: i32) -> (i32, i32) {
    %c0_i32 = arith.constant 0 : i32
    %c0_i32_0 = arith.constant 0 : i32
    %c0_i32_1 = arith.constant 0 : i32
    return %c0_i32, %c0_i32_0 : i32, i32
  }
  func.func @transform_6(%arg0: i32) -> (i32, i32, i32) {
    %c0_i32 = arith.constant 0 : i32
    %c0_i32_0 = arith.constant 0 : i32
    %c0_i32_1 = arith.constant 0 : i32
    return %arg0, %c0_i32, %c0_i32_0 : i32, i32, i32
  }
  func.func @transform_7(%arg0: i32) -> (i32, i32, i32) {
    %c0_i32 = arith.constant 0 : i32
    %c0_i32_0 = arith.constant 0 : i32
    %c0_i32_1 = arith.constant 0 : i32
    return %arg0, %c0_i32, %c0_i32_0 : i32, i32, i32
  }
}

</mosaic_0001>

<bundles_post_ra>
// kernel: tpu_custom_call.1
= control target key start
LH: loop header
LB: loop body
LE: loop exit
PB: predicated region body
PF: predicated region fallthrough
CT: control target
= control target key end

     0   :  { %s891_s24 = smov 0   ;;  %s991_s0 = inlined_call_operand.vmem [shape: f32[2,8,32], index: 0, kind: input, shape index: {}]   ;;  %s992_s1 = inlined_call_operand.vmem [shape: f32[2,1,8], index: 1, kind: input, shape index: {}]   ;;  %s993_s2 = inlined_call_operand.vmem [shape: f32[32,128], index: 2, kind: input, shape index: {}]   ;;  %s994_s3 = inlined_call_operand.vmem [shape: f32[1,128], index: 3, kind: input, shape index: {}]   ;;  %s995_s4 = inlined_call_operand.vmem [shape: f32[128,3], index: 4, kind: input, shape index: {}]   ;;  %s996_s5 = inlined_call_operand.vmem [shape: f32[1,3], index: 5, kind: input, shape index: {}]   ;;  %s997_s6 = inlined_call_operand.vmem [shape: f32[2,3,32], index: 6, kind: output, shape index: {0}]   ;;  %s998_s7 = inlined_call_operand.vmem [shape: f32[2,3,8], index: 7, kind: output, shape index: {1}]  }
   0x1 LB: > { %s702_s25 = sadd.s32 4294967295, %s845_s24   ;;  %p706_p0 = scmp.ge.s32.totalorder %s845_s24, 1  ;;  %s845_s24 = sphi %s891_s24, %s18_s24  }
   0x2   : > { %p247_p1 = scmp.lt.s32.totalorder %s845_s24, 3 }
   0x4   : > { %p248_p2 = pnand %p706_p0, %p247_p1 }
   0x5   : > { %v301_v0 = vld [vmem:[%s993_s2] sm:$0xff] (!%p248_p2)  ;;  %v302_v1 = vld [vmem:[%s993_s2 + $0x8] sm:$0xff] (!%p248_p2)  ;;  %v303_v2 = vld [vmem:[%s993_s2 + $0x10] sm:$0xff] (!%p248_p2)  ;;  %v847_v3 = vmov (!%p248_p2), 0.0|0.0   ;;  %vm848_vm0 = vmmov (!%p248_p2), 0   ;;  %v849_v6 = vmov (!%p248_p2), 0.0   ;;  %v514_v42 = vlaneseq (!%p248_p2) }
   0x6   : > { %251 = sbr.rel (%p248_p2) target bundleno = 1113 (0x459), region = 44  ;;  %791 = vmatprep.subr.bf16.mxu0 (!%p248_p2), %v847_v3  ;;  %v792_v4 = vpack.c.bf16 (!%p248_p2), %v302_v1, %v301_v0  ;;  %v304_v5 = vld [vmem:[%s993_s2 + $0x18] sm:$0xff] (!%p248_p2)  ;;  %748 = vmatprep.mubr.msk.f32.mxu0 (!%p248_p2), %vm848_vm0, %v849_v6  ;;  %p284_p3 = scmp.lt.s32.totalorder (!%p248_p2), %s702_s25, 1  ;;  %v387_v7 = vld [vmem:[%s995_s4] sm:$0xff] (!%p248_p2)  ;;  %v388_v8 = vld [vmem:[%s995_s4 + $0x8] sm:$0xff] (!%p248_p2)  ;;  %vm312_vm1 = vcmask (!%p248_p2), 261120  }
   0x7   : > { %797 = vmatprep.subr.bf16.mxu1 (!%p248_p2), %v847_v3  ;;  %v798_v9 = vpack.c.bf16 (!%p248_p2), %v388_v8, %v387_v7  ;;  %v389_v10 = vld [vmem:[%s995_s4 + $0x10] sm:$0xff] (!%p248_p2)  ;;  %v390_v11 = vld [vmem:[%s995_s4 + $0x18] sm:$0xff] (!%p248_p2)  ;;  %783 = vmatprep.mubr.msk.f32.mxu1 (!%p248_p2), %vm848_vm0, %v849_v6  ;;  %v795_v12 = vpack.c.bf16 (!%p248_p2), %v304_v5, %v303_v2  ;;  %v391_v14 = vld [vmem:[%s995_s4 + $0x20] sm:$0xff] (!%p248_p2)  ;;  %v515_v44 = vshrl.u32 (!%p248_p2), %v514_v42, 7  ;;  %v850_v46 = vmov (!%p248_p2), 0  }
   0x8   : > { %793 = vmatpush3.bf16.msra.mxu0 (!%p248_p2), %v792_v4  ;;  %v801_v13 = vpack.c.bf16 (!%p248_p2), %v390_v11, %v389_v10  ;;  %v392_v15 = vld [vmem:[%s995_s4 + $0x28] sm:$0xff] (!%p248_p2)  ;;  %v393_v18 = vld [vmem:[%s995_s4 + $0x30] sm:$0xff] (!%p248_p2)  ;;  %v394_v19 = vld [vmem:[%s995_s4 + $0x38] sm:$0xff] (!%p248_p2)  ;;  %vm520_vm4 = vcmask (!%p248_p2), 59392   ;;  %vm532_vm5 = vcmask (!%p248_p2), 64512   ;;  %vm606_vm6 = vcmask (!%p248_p2), 256000  }
   0x9   : > { %794 = vmatprep.subr.bf16.mxu0 (!%p248_p2), %v847_v3  ;;  %799 = vmatpush3.bf16.msra.mxu1 (!%p248_p2), %v798_v9  ;;  %v804_v17 = vpack.c.bf16 (!%p248_p2), %v392_v15, %v391_v14  ;;  %v807_v20 = vpack.c.bf16 (!%p248_p2), %v394_v19, %v393_v18  ;;  %v395_v21 = vld [vmem:[%s995_s4 + $0x40] sm:$0xff] (!%p248_p2)  ;;  %v396_v22 = vld [vmem:[%s995_s4 + $0x48] sm:$0xff] (!%p248_p2)  ;;  %v397_v24 = vld [vmem:[%s995_s4 + $0x50] sm:$0xff] (!%p248_p2)  ;;  %v516_v45 = vsub.s32 (!%p248_p2), 0, %v515_v44 }
   0xa   : > { %800 = vmatprep.subr.bf16.mxu1 (!%p248_p2), %v847_v3  ;;  %v810_v23 = vpack.c.bf16 (!%p248_p2), %v396_v22, %v395_v21  ;;  %v398_v25 = vld [vmem:[%s995_s4 + $0x58] sm:$0xff] (!%p248_p2)  ;;  %v399_v27 = vld [vmem:[%s995_s4 + $0x60] sm:$0xff] (!%p248_p2)  ;;  %v400_v28 = vld [vmem:[%s995_s4 + $0x68] sm:$0xff] (!%p248_p2) }
   0xb   : > { %v813_v26 = vpack.c.bf16 (!%p248_p2), %v398_v25, %v397_v24  ;;  %v816_v29 = vpack.c.bf16 (!%p248_p2), %v400_v28, %v399_v27  ;;  %v401_v30 = vld [vmem:[%s995_s4 + $0x70] sm:$0xff] (!%p248_p2)  ;;  %v402_v31 = vld [vmem:[%s995_s4 + $0x78] sm:$0xff] (!%p248_p2)  ;;  %v710_v33 = vld [vmem:[%s994_s3] ss:$0 sm:$0xff] (!%p248_p2) }
   0xc   : > { %796 = vmatpush3.bf16.msra.mxu0 (!%p248_p2), %v795_v12  ;;  %v819_v32 = vpack.c.bf16 (!%p248_p2), %v402_v31, %v401_v30  ;;  %v712_v38 = vld [vmem:[%s996_s5] ss:$0 sm:$0xff] (!%p248_p2) }
   0xd   : > { %s1000_s25 = smov (!%p284_p3, %s702_s25), 1  ;;  %802 = vmatpush3.bf16.msra.mxu1 %v801_v13  ;;  %786 = vmatprep.subr.mxu0 %v849_v6 }
   0xe   : > { %s707_s19 = sshll.u32 %s1000_s25, 3  ;;  %803 = vmatprep.subr.bf16.mxu1 %v847_v3  ;;  %s290_s11 = scalar_lea.vmem %s992_s1, %s1000_s25 }
   0xf   : > { %s287_s28 = scalar_lea.vmem %s991_s0, %s707_s19  ;;  %v300_v43 = vld [vmem:[%s290_s11] sm:$0x1]  ;;  %s708_s12 = sshll.u32 %s1000_s25, 2 }
  0x10   : > { %v299_v16 = vld [vmem:[%s287_s28] sm:$0xff]  ;;  %vm512_vm2 = vcmp.gt.f32.partialorder %v300_v43, 0.0  ;;  %s298_s15 = scalar_lea.vmem %s998_s7, %s708_s12  ;;  %s294_s18 = scalar_lea.vmem %s997_s6, %s708_s12 }
  0x11   : > { %749 = vmatmul.mubr.msk.f32.vlgmr.msra.gmra.mrb[0].mxu0 %vm312_vm1, %v299_v16  ;;  %805 = vmatpush3.bf16.msra.mxu1 %v804_v17  ;;  %v513_v47 = vsel %vm512_vm2, 1, %v850_v46 }
  0x12   : > { %787 = vmatpush3.msra.mxu0 %v299_v16  ;;  %788 = vmatprep.mubr.msk.f32.mxu0 %vm848_vm0, %v849_v6  ;;  %v517_v48 = vrot.slane %v513_v47, %v516_v45 }
  0x13   : > { %806 = vmatprep.subr.bf16.mxu1 %v847_v3 }
  0x14   : > { %vm518_vm3 = vcmp.eq.s32.totalorder %v517_v48, 1 }
  0x15   : > { %808 = vmatpush3.bf16.msra.mxu1 %v807_v20 }
  0x16   : > { %809 = vmatprep.subr.bf16.mxu1 %v847_v3 }
  0x19   : > { %811 = vmatpush3.bf16.msra.mxu1 %v810_v23 }
  0x1a   : > { %812 = vmatprep.subr.bf16.mxu1 %v847_v3 }
  0x1d   : > { %814 = vmatpush3.bf16.msra.mxu1 %v813_v26 }
  0x1e   : > { %815 = vmatprep.subr.bf16.mxu1 %v847_v3 }
  0x21   : > { %817 = vmatpush3.bf16.msra.mxu1 %v816_v29 }
  0x22   : > { %818 = vmatprep.subr.bf16.mxu1 %v847_v3 }
  0x25   : > { %820 = vmatpush3.bf16.msra.mxu1 %v819_v32 }
  0xe4   : > { %v382_v34 = vpop.f32.mrb[0].mxu0 }
  0xe5   : > { %v383_v35 = vadd.f32 %v710_v33, %v382_v34  ;;  %v750_v36 = vpop.f32.mrb[1].mxu0 }
  0xe7   : > { %833 = vtanh.f32 %v383_v35 }
  0xf1   : > { %v834_v37 = vpop.eup %833 }
  0xf2   : > { %784 = vmatmul.mubr.f32.vlgmr.msra.gmra.mrb[0].mxu1 %v834_v37 }
 0x1c5   : > { %v476_v39 = vpop.f32.mrb[0].mxu1 }
 0x1c6   : > { %v785_v40 = vpop.f32.mrb[1].mxu1  ;;  %v477_v41 = vadd.f32 %v712_v38, %v476_v39 }
 0x1c8   : > { %480 = vxpose.xlu0.b32.start.end [1/1] (short) (narrow) %v477_v41, 8 }
 0x248   : > { %v496_v49 = vpop.trf.xlu0 }
 0x249   : > { %v519_v50 = vsel %vm518_vm3, %v496_v49, -1000000.0 }
 0x24a   : > { %v521_v51 = vsel %vm520_vm4, %v519_v50, -inf }
 0x24b   : > { %522 = vmax.xlane.f32.xlu0 %v521_v51 }
 0x2d8   : > { %v523_v52 = vpop.xlane.xlu0 %522 }
 0x2d9   : > { %v524_v53 = vsub.f32 %v519_v50, %v523_v52 }
 0x2db   : > { %v525_v54 = vmul.f32 1.442695, %v524_v53 }
 0x2dd   : > { %835 = vpow2.f32 %v525_v54 }
 0x2e7   : > { %v836_v55 = vpop.eup %835 }
 0x2e8   : > { %v527_v56 = vsel %vm520_vm4, %v836_v55, 0.0 }
 0x2e9   : > { %528 = vadd.xlane.f32.xlu1 %v527_v56 }
 0x376   : > { %v529_v57 = vpop.xlane.xlu1 %528 }
 0x377   : > { %837 = vrcp.f32 %v529_v57 }
 0x381   : > { %v838_v58 = vpop.eup %837 }
 0x382   : > { %v531_v59 = vmul.f32 %v838_v58, %v836_v55 }
 0x384   : > { %789 = vmatmul.mubr.msk.f32.vlgmr.msra.gmra.mrb[2].mxu0 %vm532_vm5, %v531_v59  ;;  %608 = vst.msk [vmem:[%s298_s15] sm:$0x7] %vm520_vm4, %v531_v59 }
 0x457   : > { %v602_v60 = vpop.f32.mrb[2].mxu0 }
 0x458   : > { %607 = vst.msk [vmem:[%s294_s18] sm:$0x7] %vm606_vm6, %v602_v60  ;;  %v790_v61 = vpop.f32.mrb[3].mxu0 }
 0x459 PF: > { %s18_s24 = sadd.s32 1, %s845_s24  }
 0x45a   : > { %p15_p4 = scmp.ge.s32.totalorder %s18_s24, 4  }
 0x45c   :  { %17 = sbr.rel (!%p15_p4) target bundleno = 1 (0x1), region = 89 }

</bundles_post_ra>
